<compile_context>
chip_gen: v7x
topology: tpu7x:2x2x1
jax: 0.10.0
libtpu: 0.0.40
codegen_flags: <defaults>
</compile_context>

<pallas_src>
import jax
import jax.numpy as jnp
from jax import lax
from jax.experimental import pallas as pl
from jax.experimental.pallas import tpu as pltpu


FEAT_CHANNELS = (64, 128, 256, 512, 512, 512)      # channels of feats[0..5] (VGG-like)
DOWNSAMPLE = (True, True, True, True, False, False)


def _round_up(x, m):
    return (x + m - 1) // m * m


def _choose_hw_tile(hw, cap):
    """HW (sublane) tile: full HW if it fits, else the largest multiple of 8
    <= cap that divides HW (no padding); pad only if no such divisor exists."""
    if hw <= cap:
        return hw, hw
    cap8 = max(8, cap - cap % 8)
    for t in range(cap8, 7, -8):
        if hw % t == 0:
            return t, hw
    return cap8, _round_up(hw, cap8)


# ---------------------------------------------------------------------------
# Pallas kernel factory: one kernel per shape group (static shapes closed over).
#   feat_ref : (N, hw_tile, C)   channels on lanes, HW rows on sublanes
#   w_ref    : (2C, Cout)        rows [0:C] gap weights, rows [C:] gmp weights
#   b_ref    : (1, Cout)         f32 bias
#   out_ref  : (N, Cout)         written on the last hw tile only
#   sum_acc  : (N, C) f32        running sum     max_acc : (N, C) f32 running max
# ---------------------------------------------------------------------------
def _make_group_kernel(*, n, c, hw, hw_tile, k_tiles, use_mxu_sum):
    inv_hw = 1.0 / float(hw)
    padded = (k_tiles * hw_tile != hw)
    tail_valid = hw - (k_tiles - 1) * hw_tile       # valid rows in the last tile

    def kernel(feat_ref, w_ref, b_ref, out_ref, sum_acc, max_acc):
        k = pl.program_id(1)

        @pl.when(k == 0)
        def _init():
            sum_acc[...] = jnp.zeros_like(sum_acc)
            max_acc[...] = jnp.full_like(max_acc, -jnp.inf)

        f = feat_ref[...]                           # native dtype, no blanket upcast

        # ---- running sum over this HW tile (zero-padded rows contribute 0) ----
        if use_mxu_sum:
            # Offload the sublane reduction to the otherwise-idle MXU so the VPU
            # only carries the running max (v7x is VALU-bound once HBM is fast).
            ones_row = jnp.ones((1, hw_tile), f.dtype)
            tile_sums = [jnp.dot(ones_row, f[i], preferred_element_type=jnp.float32)
                         for i in range(n)]
            sum_acc[...] += jnp.concatenate(tile_sums, axis=0)
        else:
            sum_acc[...] += jnp.sum(f, axis=1, dtype=jnp.float32)

        # ---- running max over this HW tile ----
        def _update_max(vals):
            max_acc[...] = jnp.maximum(
                max_acc[...], jnp.max(vals, axis=1).astype(jnp.float32))

        if not padded:
            _update_max(f)                          # common case: no mask at all
        else:
            # Only the last tile straddles the valid extent; interior tiles skip
            # the compare+select entirely.
            is_last = k == k_tiles - 1

            @pl.when(is_last)
            def _masked():
                row = lax.broadcasted_iota(jnp.int32, (1, hw_tile, 1), 1)
                _update_max(jnp.where(row < tail_valid, f,
                                      jnp.array(-jnp.inf, f.dtype)))

            @pl.when(jnp.logical_not(is_last))
            def _plain():
                _update_max(f)

        # ---- finalize: fused 1x1 conv on [gap | gmp] + ReLU ----
        @pl.when(k == k_tiles - 1)
        def _finalize():
            gap = sum_acc[...] * inv_hw             # mean = sum * 1/HW (f32)
            gmp = max_acc[...]
            wg = w_ref[:c, :].astype(jnp.float32)   # gap half of the conv weight
            wm = w_ref[c:, :].astype(jnp.float32)   # gmp half
            acc = (jnp.dot(gap, wg, preferred_element_type=jnp.float32)
                   + jnp.dot(gmp, wm, preferred_element_type=jnp.float32)
                   + b_ref[...])
            out_ref[...] = jnp.maximum(acc, 0.0).astype(out_ref.dtype)

    return kernel


# ---------------------------------------------------------------------------
# Wrapper: one zero-pad-free launch per (HW, C, Cout) shape group.
# ---------------------------------------------------------------------------
def fused_style_codes(feats, conv_params, *, hw_tile_cap=512, feature_dtype=None):
    """feats: list of NHWC (N, H, W, C_i) feature maps; conv_params: list of
    (w_i, b_i) with w_i shaped (Cout_i, 2*C_i, 1, 1) (PyTorch Conv2d layout).
    Returns a list of (N, Cout_i, 1, 1) style codes.

    feature_dtype=jnp.bfloat16 halves feature/weight HBM traffic; accumulation
    stays in f32.  (Weight packing below is tiny; cache it across calls when
    the conv params are static.)"""
    num_heads = len(feats)
    n = feats[0].shape[0]
    out_dtype = feats[0].dtype
    if feature_dtype is None:
        feature_dtype = feats[0].dtype

    # Group heads with identical (HW, C, Cout): zero spatial/channel padding
    # inside a group and equal per-head cost on the "parallel" grid axis.
    groups = {}
    for i, (f, (w, _)) in enumerate(zip(feats, conv_params)):
        _, h, wdim, c = f.shape
        groups.setdefault((h * wdim, c, w.shape[0]), []).append(i)

    codes = [None] * num_heads
    for (hw, c, cout), idxs in groups.items():
        g = len(idxs)
        hw_tile, hw_pad = _choose_hw_tile(hw, hw_tile_cap)
        k_tiles = hw_pad // hw_tile
        use_mxu_sum = hw_tile >= 8                  # MXU not worth it on tiny tiles

        # (G, N, HW, C) channels-last slab: reshape is free; the only data movement
        # is the per-group stack (multi-head groups) + optional fused dtype cast.
        grp = [feats[i].reshape(n, hw, c) for i in idxs]
        fstack = grp[0][None] if g == 1 else jnp.stack(grp, axis=0)
        fstack = fstack.astype(feature_dtype)
        if hw_pad != hw:
            fstack = jnp.pad(fstack, ((0, 0), (0, 0), (0, hw_pad - hw), (0, 0)))

        # Per-group conv1x1 weights (G, 2C, Cout) and biases (G, 1, Cout).
        w_stack = jnp.stack(
            [jnp.transpose(conv_params[i][0].reshape(cout, 2 * c)).astype(feature_dtype)
             for i in idxs], axis=0)
        b_stack = jnp.stack(
            [conv_params[i][1].reshape(1, cout).astype(jnp.float32) for i in idxs],
            axis=0)

        kernel = _make_group_kernel(n=n, c=c, hw=hw, hw_tile=hw_tile,
                                    k_tiles=k_tiles, use_mxu_sum=use_mxu_sum)

        # VMEM budget: double-buffered feature block + weights/bias/out + scratch.
        fsize = jnp.dtype(feature_dtype).itemsize
        est = (2 * n * hw_tile * c * fsize          # feature blocks (x2 buffers)
               + 2 * 2 * c * cout * fsize           # weight blocks
               + 2 * cout * 4 + 2 * n * cout * 4    # bias + output blocks
               + 2 * n * c * 4 * 2)                 # f32 sum/max scratch
        vmem_limit = int(min(64 << 20, max(32 << 20, 2 * est)))

        out = pl.pallas_call(
            kernel,
            out_shape=jax.ShapeDtypeStruct((g, n, cout), out_dtype),
            grid_spec=pltpu.PrefetchScalarGridSpec(
                num_scalar_prefetch=0,
                grid=(g, k_tiles),
                in_specs=[
                    pl.BlockSpec((None, n, hw_tile, c),
                                 lambda gi, k: (gi, 0, k, 0)),
                    # Weight/bias blocks are constant over k; Pallas only re-fetches
                    # them when the head index changes.  (pl.Buffered(1) could drop
                    # the second buffer; left at the default for portability.)
                    pl.BlockSpec((None, 2 * c, cout), lambda gi, k: (gi, 0, 0)),
                    pl.BlockSpec((None, 1, cout), lambda gi, k: (gi, 0, 0)),
                ],
                out_specs=pl.BlockSpec((None, n, cout), lambda gi, k: (gi, 0, 0)),
                scratch_shapes=[pltpu.VMEM((n, c), jnp.float32),   # running sum
                                pltpu.VMEM((n, c), jnp.float32)],  # running max
            ),
            compiler_params=pltpu.CompilerParams(
                dimension_semantics=("parallel", "arbitrary"),
                vmem_limit_bytes=vmem_limit),
        )(fstack, w_stack, b_stack)

        for j, i in enumerate(idxs):
            codes[i] = out[j].reshape(n, cout, 1, 1)
    return codes


# ---------------------------------------------------------------------------
# Synthetic frozen encoder (plain-JAX glue), channels-last so the kernel never
# needs a transpose.
# TODO(synk): the real module receives a pretrained VGG encoder via __init__;
# this is a deterministic NHWC stand-in with the module's channel counts.
# ---------------------------------------------------------------------------
def _encoder_stage(x, w, b, downsample):
    # x: (N, H, W, C_in) NHWC; w: (C_out, C_in); b: (C_out,)
    if downsample:
        nb, h, wd, c = x.shape
        x = x.reshape(nb, h // 2, 2, wd // 2, 2, c).mean(axis=(2, 4))
    y = jnp.einsum("nhwc,oc->nhwo", x, w) + b
    return jax.nn.relu(y)


def encode_with_intermediate(params, x_nchw):
    x = jnp.transpose(x_nchw, (0, 2, 3, 1))        # NCHW input -> NHWC once
    feats = []
    for (w, b), down in zip(params["enc"], DOWNSAMPLE):
        x = _encoder_stage(x, w, b, down)
        feats.append(x)
    return feats                                    # list of (N, H, W, C_i)


def style_extractor_forward(params, x, index, *, hw_tile_cap=512, feature_dtype=None):
    feats = encode_with_intermediate(params, x)
    sel_feats = [feats[i] for i in index]
    sel_conv = [params["conv1x1"][i] for i in index]
    return fused_style_codes(sel_feats, sel_conv,
                             hw_tile_cap=hw_tile_cap, feature_dtype=feature_dtype)


# ---------------------------------------------------------------------------
# Deterministic parameter initialization (shapes per the module's __init__).
# ---------------------------------------------------------------------------
def init_params(key):
    keys = iter(jax.random.split(key, 4 * len(FEAT_CHANNELS)))
    enc_params, conv_params = [], []
    in_c = 3
    for c_out in FEAT_CHANNELS:
        w = jax.random.normal(next(keys), (c_out, in_c), jnp.float32) / jnp.sqrt(in_c)
        b = 0.01 * jax.random.normal(next(keys), (c_out,), jnp.float32)
        enc_params.append((w, b))
        in_c = c_out
    for c in FEAT_CHANNELS:
        # nn.Conv2d(2c, c, kernel_size=1, bias=True) -> weight (c, 2c, 1, 1)
        w = jax.random.normal(next(keys), (c, 2 * c, 1, 1), jnp.float32) / jnp.sqrt(2 * c)
        b = 0.01 * jax.random.normal(next(keys), (c,), jnp.float32)
        conv_params.append((w, b))
    return {"enc": enc_params, "conv1x1": conv_params}


# ---------------------------------------------------------------------------
# Plain-JAX reference of the StyleExtractor head, for correctness checks.
# ---------------------------------------------------------------------------
def reference_forward(params, x, index):
    feats = encode_with_intermediate(params, x)     # NHWC f32
    codes = []
    for i in index:
        f = feats[i]
        gap = f.mean(axis=(1, 2))                   # (N, C)
        gmp = f.max(axis=(1, 2))                    # (N, C)
        cat = jnp.concatenate([gap, gmp], axis=1)   # (N, 2C)
        w, b = params["conv1x1"][i]
        w2d = w.reshape(w.shape[0], w.shape[1])     # (Cout, 2C)
        y = cat @ w2d.T + b
        codes.append(jax.nn.relu(y).reshape(f.shape[0], -1, 1, 1))
    return codes


if __name__ == "__main__":
    key = jax.random.PRNGKey(0)
    k_in, k_params = jax.random.split(key)
    x = jax.random.normal(k_in, (2, 3, 32, 32), dtype=jnp.float32)   # NCHW, like PyTorch
    params = init_params(k_params)
    index = (0, 1, 2, 3, 4, 5)

    refs = reference_forward(params, x, index)

    # 1) f32 path, default tiling (shape-grouped launches, single HW tile each).
    codes = jax.block_until_ready(style_extractor_forward(params, x, index))
    for c_, r in zip(codes, refs):
        assert c_.shape == r.shape, (c_.shape, r.shape)
        assert jnp.allclose(c_, r, atol=1e-4, rtol=1e-4), float(jnp.max(jnp.abs(c_ - r)))

    # 2) f32 path with a small HW tile cap -> exercises the multi-tile reduction.
    codes = jax.block_until_ready(
        style_extractor_forward(params, x, index, hw_tile_cap=64))
    for c_, r in zip(codes, refs):
        assert jnp.allclose(c_, r, atol=1e-4, rtol=1e-4), float(jnp.max(jnp.abs(c_ - r)))

    # 3) bf16 feature/weight path (halved HBM traffic); accumulation stays f32.
    codes = jax.block_until_ready(
        style_extractor_forward(params, x, index, feature_dtype=jnp.bfloat16))
    for c_, r in zip(codes, refs):
        d = jnp.abs(c_.astype(jnp.float32) - r)
        assert jnp.allclose(c_.astype(jnp.float32), r, atol=1e-1, rtol=5e-2), float(d.max())

    print("KERNEL_OK")
</pallas_src>

<mosaic_0001>
module attributes {stable_mosaic.version = 11 : i64} {
  func.func @kernel(%arg0: i32, %arg1: i32, %arg2: memref<1x2x256x64xf32, #tpu.memory_space<vmem>>, %arg3: memref<1x128x64xf32, #tpu.memory_space<vmem>>, %arg4: memref<1x1x64xf32, #tpu.memory_space<vmem>>, %arg5: memref<1x2x64xf32, #tpu.memory_space<vmem>>, %arg6: memref<2x64xf32, #tpu.memory_space<vmem>>, %arg7: memref<2x64xf32, #tpu.memory_space<vmem>>) attributes {dimension_semantics = [#tpu.dimension_semantics<parallel>, #tpu.dimension_semantics<arbitrary>], iteration_bounds = array<i64: 1, 1>, scalar_prefetch = 0 : i64, scratch_operands = 2 : i64, tpu.core_type = #tpu.core_type<tc>, window_params = [{transform_indices = @transform_0, window_bounds = array<i64: 1, 2, 256, 64>}, {transform_indices = @transform_1, window_bounds = array<i64: 1, 128, 64>}, {transform_indices = @transform_2, window_bounds = array<i64: 1, 1, 64>}, {transform_indices = @transform_3, window_bounds = array<i64: 1, 2, 64>}]} {
    %c0_i32 = arith.constant 0 : i32
    %0 = arith.cmpi eq, %arg1, %c0_i32 : i32
    %1 = arith.extui %0 : i1 to i32
    %c0_i32_0 = arith.constant 0 : i32
    %2 = arith.cmpi ne, %1, %c0_i32_0 : i32
    scf.if %2 {
      %cst_17 = arith.constant 0.000000e+00 : f32
      %23 = vector.broadcast %cst_17 : f32 to vector<2x64xf32>
      %c0_18 = arith.constant 0 : index
      %c0_19 = arith.constant 0 : index
      %24 = vector.load %arg6[%c0_18, %c0_19] : memref<2x64xf32, #tpu.memory_space<vmem>>, vector<2x64xf32>
      tpu.vector_store %arg6[%c0_18, %c0_19], %23 {strides = array<i32>} : memref<2x64xf32, #tpu.memory_space<vmem>>, vector<2x64xf32>,
      %cst_20 = arith.constant 0xFF800000 : f32
      %25 = vector.broadcast %cst_20 : f32 to vector<2x64xf32>
      %c0_21 = arith.constant 0 : index
      %c0_22 = arith.constant 0 : index
      %26 = vector.load %arg7[%c0_21, %c0_22] : memref<2x64xf32, #tpu.memory_space<vmem>>, vector<2x64xf32>
      tpu.vector_store %arg7[%c0_21, %c0_22], %25 {strides = array<i32>} : memref<2x64xf32, #tpu.memory_space<vmem>>, vector<2x64xf32>,
    } else {
    }
    %c0 = arith.constant 0 : index
    %c0_1 = arith.constant 0 : index
    %c0_2 = arith.constant 0 : index
    %c0_3 = arith.constant 0 : index
    %3 = vector.load %arg2[%c0, %c0_1, %c0_2, %c0_3] : memref<1x2x256x64xf32, #tpu.memory_space<vmem>>, vector<1x2x256x64xf32>
    %4 = vector.shape_cast %3 : vector<1x2x256x64xf32> to vector<2x256x64xf32>
    %cst = arith.constant 1.000000e+00 : f32
    %5 = vector.broadcast %cst : f32 to vector<1x256xf32>
    %6 = vector.extract_strided_slice %4 {offsets = [0, 0, 0], sizes = [1, 256, 64], strides = [1, 1, 1]} : vector<2x256x64xf32> to vector<1x256x64xf32>
    %7 = vector.shape_cast %6 : vector<1x256x64xf32> to vector<256x64xf32>
    %cst_4 = arith.constant dense<0.000000e+00> : vector<1x64xf32>
    %8 = tpu.matmul %5, %7, %cst_4 {dimension_numbers = #tpu.dot_dimension_numbers<[1], [0], [0], [1], [0, 0, 1, 1], [], []>} : vector<1x256xf32>, vector<256x64xf32>, vector<1x64xf32> -> vector<1x64xf32>
    %9 = vector.extract_strided_slice %4 {offsets = [1, 0, 0], sizes = [1, 256, 64], strides = [1, 1, 1]} : vector<2x256x64xf32> to vector<1x256x64xf32>
    %10 = vector.shape_cast %9 : vector<1x256x64xf32> to vector<256x64xf32>
    %cst_5 = arith.constant dense<0.000000e+00> : vector<1x64xf32>
    %11 = tpu.matmul %5, %10, %cst_5 {dimension_numbers = #tpu.dot_dimension_numbers<[1], [0], [0], [1], [0, 0, 1, 1], [], []>} : vector<1x256xf32>, vector<256x64xf32>, vector<1x64xf32> -> vector<1x64xf32>
    %c0_6 = arith.constant 0 : index
    %c0_7 = arith.constant 0 : index
    %12 = vector.load %arg6[%c0_6, %c0_7] : memref<2x64xf32, #tpu.memory_space<vmem>>, vector<2x64xf32>
    %13 = tpu.concatenate %8, %11 in 0 : vector<1x64xf32>, vector<1x64xf32> -> vector<2x64xf32>
    %14 = arith.addf %12, %13 : vector<2x64xf32>
    %c0_8 = arith.constant 0 : index
    %c0_9 = arith.constant 0 : index
    %15 = vector.load %arg6[%c0_8, %c0_9] : memref<2x64xf32, #tpu.memory_space<vmem>>, vector<2x64xf32>
    tpu.vector_store %arg6[%c0_8, %c0_9], %14 {strides = array<i32>} : memref<2x64xf32, #tpu.memory_space<vmem>>, vector<2x64xf32>,
    %c0_10 = arith.constant 0 : index
    %c0_11 = arith.constant 0 : index
    %16 = vector.load %arg7[%c0_10, %c0_11] : memref<2x64xf32, #tpu.memory_space<vmem>>, vector<2x64xf32>
    %cst_12 = arith.constant dense<0xFF800000> : vector<2x64xf32>
    %17 = vector.multi_reduction <maximumf>, %4, %cst_12 [1] : vector<2x256x64xf32> to vector<2x64xf32>
    %18 = arith.maximumf %16, %17 : vector<2x64xf32>
    %c0_13 = arith.constant 0 : index
    %c0_14 = arith.constant 0 : index
    %19 = vector.load %arg7[%c0_13, %c0_14] : memref<2x64xf32, #tpu.memory_space<vmem>>, vector<2x64xf32>
    tpu.vector_store %arg7[%c0_13, %c0_14], %18 {strides = array<i32>} : memref<2x64xf32, #tpu.memory_space<vmem>>, vector<2x64xf32>,
    %c0_i32_15 = arith.constant 0 : i32
    %20 = arith.cmpi eq, %arg1, %c0_i32_15 : i32
    %21 = arith.extui %20 : i1 to i32
    %c0_i32_16 = arith.constant 0 : i32
    %22 = arith.cmpi ne, %21, %c0_i32_16 : i32
    scf.if %22 {
      %c0_17 = arith.constant 0 : index
      %c0_18 = arith.constant 0 : index
      %23 = vector.load %arg6[%c0_17, %c0_18] : memref<2x64xf32, #tpu.memory_space<vmem>>, vector<2x64xf32>
      %cst_19 = arith.constant 3.906250e-03 : f32
      %24 = vector.broadcast %cst_19 : f32 to vector<2x64xf32>
      %25 = arith.mulf %23, %24 : vector<2x64xf32>
      %c0_20 = arith.constant 0 : index
      %c0_21 = arith.constant 0 : index
      %26 = vector.load %arg7[%c0_20, %c0_21] : memref<2x64xf32, #tpu.memory_space<vmem>>, vector<2x64xf32>
      %c0_22 = arith.constant 0 : index
      %c0_23 = arith.constant 0 : index
      %c0_24 = arith.constant 0 : index
      %27 = vector.load %arg3[%c0_22, %c0_23, %c0_24] : memref<1x128x64xf32, #tpu.memory_space<vmem>>, vector<1x64x64xf32>
      %28 = vector.shape_cast %27 : vector<1x64x64xf32> to vector<64x64xf32>
      %c0_25 = arith.constant 0 : index
      %c64 = arith.constant 64 : index
      %c0_26 = arith.constant 0 : index
      %29 = vector.load %arg3[%c0_25, %c64, %c0_26] : memref<1x128x64xf32, #tpu.memory_space<vmem>>, vector<1x64x64xf32>
      %30 = vector.shape_cast %29 : vector<1x64x64xf32> to vector<64x64xf32>
      %cst_27 = arith.constant dense<0.000000e+00> : vector<2x64xf32>
      %31 = tpu.matmul %25, %28, %cst_27 {dimension_numbers = #tpu.dot_dimension_numbers<[1], [0], [0], [1], [0, 0, 1, 1], [], []>} : vector<2x64xf32>, vector<64x64xf32>, vector<2x64xf32> -> vector<2x64xf32>
      %cst_28 = arith.constant dense<0.000000e+00> : vector<2x64xf32>
      %32 = tpu.matmul %26, %30, %cst_28 {dimension_numbers = #tpu.dot_dimension_numbers<[1], [0], [0], [1], [0, 0, 1, 1], [], []>} : vector<2x64xf32>, vector<64x64xf32>, vector<2x64xf32> -> vector<2x64xf32>
      %33 = arith.addf %31, %32 : vector<2x64xf32>
      %c0_29 = arith.constant 0 : index
      %c0_30 = arith.constant 0 : index
      %c0_31 = arith.constant 0 : index
      %34 = vector.load %arg4[%c0_29, %c0_30, %c0_31] : memref<1x1x64xf32, #tpu.memory_space<vmem>>, vector<1x1x64xf32>
      %35 = vector.shape_cast %34 : vector<1x1x64xf32> to vector<1x64xf32>
      %36 = vector.broadcast %35 : vector<1x64xf32> to vector<2x64xf32>
      %37 = arith.addf %33, %36 : vector<2x64xf32>
      %cst_32 = arith.constant 0.000000e+00 : f32
      %38 = vector.broadcast %cst_32 : f32 to vector<2x64xf32>
      %39 = arith.maximumf %37, %38 : vector<2x64xf32>
      %c0_33 = arith.constant 0 : index
      %c0_34 = arith.constant 0 : index
      %c0_35 = arith.constant 0 : index
      %40 = vector.load %arg5[%c0_33, %c0_34, %c0_35] : memref<1x2x64xf32, #tpu.memory_space<vmem>>, vector<1x2x64xf32>
      %41 = vector.shape_cast %40 : vector<1x2x64xf32> to vector<2x64xf32>
      %42 = vector.shape_cast %39 : vector<2x64xf32> to vector<1x2x64xf32>
      tpu.vector_store %arg5[%c0_33, %c0_34, %c0_35], %42 {strides = array<i32>} : memref<1x2x64xf32, #tpu.memory_space<vmem>>, vector<1x2x64xf32>,
    } else {
    }
    return
  }
  func.func @transform_0(%arg0: i32, %arg1: i32) -> (i32, i32, i32, i32) {
    %c0_i32 = arith.constant 0 : i32
    %c0_i32_0 = arith.constant 0 : i32
    %c0_i32_1 = arith.constant 0 : i32
    return %arg0, %c0_i32, %arg1, %c0_i32_0 : i32, i32, i32, i32
  }
  func.func @transform_1(%arg0: i32, %arg1: i32) -> (i32, i32, i32) {
    %c0_i32 = arith.constant 0 : i32
    %c0_i32_0 = arith.constant 0 : i32
    %c0_i32_1 = arith.constant 0 : i32
    return %arg0, %c0_i32, %c0_i32_0 : i32, i32, i32
  }
  func.func @transform_2(%arg0: i32, %arg1: i32) -> (i32, i32, i32) {
    %c0_i32 = arith.constant 0 : i32
    %c0_i32_0 = arith.constant 0 : i32
    %c0_i32_1 = arith.constant 0 : i32
    return %arg0, %c0_i32, %c0_i32_0 : i32, i32, i32
  }
  func.func @transform_3(%arg0: i32, %arg1: i32) -> (i32, i32, i32) {
    %c0_i32 = arith.constant 0 : i32
    %c0_i32_0 = arith.constant 0 : i32
    %c0_i32_1 = arith.constant 0 : i32
    return %arg0, %c0_i32, %c0_i32_0 : i32, i32, i32
  }
}

</mosaic_0001>

<bundles_post_ra>
// kernel: tpu_custom_call.1
= control target key start
LH: loop header
LB: loop body
LE: loop exit
PB: predicated region body
PF: predicated region fallthrough
CT: control target
= control target key end

     0   :  { %vm236_vm0 = vcmask 523264   ;;  %v821_v10 = vmov 1.0   ;;  %s1330_s0 = inlined_call_operand.vmem [shape: f32[1,2,256,64], index: 0, kind: input, shape index: {}]   ;;  %s1331_s1 = inlined_call_operand.vmem [shape: f32[1,128,64], index: 1, kind: input, shape index: {}]   ;;  %s1332_s2 = inlined_call_operand.vmem [shape: f32[1,1,64], index: 2, kind: input, shape index: {}]   ;;  %s1333_s3 = inlined_call_operand.hbm [shape: f32[1,2,64], index: 3, kind: output, shape index: {}]  }
   0x1   :  { %v70_v0 = vld [vmem:[%s1330_s0 + $0x180] sm:$0xff]  ;;  %v71_v1 = vld [vmem:[%s1330_s0 + $0x188] sm:$0xff]  ;;  %220 = vmatprep.mubr.f32.mxu1 %v821_v10  ;;  %150 = vmatprep.mubr.f32.mxu0 %v821_v10  ;;  %v882_v13 = vld [vmem:[%s1330_s0 + $0x110] sm:$0xff] }
   0x2   :  { %v38_v2 = vld [vmem:[%s1330_s0 + $0x80] sm:$0xff]  ;;  %v735_v3 = vpack.c.bf16 %v71_v1, %v70_v0  ;;  %v857_v4 = vsel %vm236_vm0, %v70_v0, -inf  ;;  %v860_v5 = vsel %vm236_vm0, %v71_v1, -inf  ;;  %v39_v6 = vld [vmem:[%s1330_s0 + $0x88] sm:$0xff]  ;;  %v887_v14 = vld [vmem:[%s1330_s0 + $0x118] sm:$0xff]  ;;  %v308_v21 = vsel %vm236_vm0, %v882_v13, -inf }
   0x3   :  { %v866_v7 = vsel %vm236_vm0, %v38_v2, -inf  ;;  %v54_v8 = vld [vmem:[%s1330_s0 + $0x100] sm:$0xff]  ;;  %v55_v9 = vld [vmem:[%s1330_s0 + $0x108] sm:$0xff]  ;;  %v703_v11 = vpack.c.bf16 %v39_v6, %v38_v2  ;;  %v877_v12 = vsel %vm236_vm0, %v39_v6, -inf  ;;  %v903_v19 = vld [vmem:[%s1330_s0 + $0x130] sm:$0xff]  ;;  %v310_v22 = vsel %vm236_vm0, %v887_v14, -inf }
   0x4   :  { %v892_v15 = vld [vmem:[%s1330_s0 + $0x120] sm:$0xff]  ;;  %v737_v16 = vpack.c.bf16 %v55_v9, %v54_v8  ;;  %v306_v17 = vsel %vm236_vm0, %v54_v8, -inf  ;;  %736 = vmatprep.subr.bf16.mxu1 %v735_v3  ;;  %v898_v18 = vld [vmem:[%s1330_s0 + $0x128] sm:$0xff]  ;;  %v307_v20 = vsel %vm236_vm0, %v55_v9, -inf  ;;  %v741_v23 = vpack.c.bf16 %v887_v14, %v882_v13  ;;  %v915_v24 = vld [vmem:[%s1330_s0 + $0x138] sm:$0xff] }
   0x5   :  { %704 = vmatprep.subr.bf16.mxu0 %v703_v11  ;;  %v920_v25 = vld [vmem:[%s1330_s0 + $0x140] sm:$0xff]  ;;  %v925_v26 = vld [vmem:[%s1330_s0 + $0x148] sm:$0xff]  ;;  %v309_v27 = vmax.f32 %v306_v17, %v308_v21  ;;  %v311_v28 = vmax.f32 %v307_v20, %v310_v22  ;;  %v312_v29 = vsel %vm236_vm0, %v892_v15, -inf  ;;  %v314_v30 = vsel %vm236_vm0, %v898_v18, -inf  ;;  %v934_v31 = vld [vmem:[%s1330_s0 + $0x150] sm:$0xff] }
   0x6   :  { %738 = vmatpush3.bf16.msra.mxu1 %v737_v16  ;;  %v939_v32 = vld [vmem:[%s1330_s0 + $0x158] sm:$0xff]  ;;  %v944_v33 = vld [vmem:[%s1330_s0 + $0x160] sm:$0xff]  ;;  %v316_v34 = vsel %vm236_vm0, %v903_v19, -inf  ;;  %v318_v35 = vsel %vm236_vm0, %v915_v24, -inf  ;;  %v320_v36 = vsel %vm236_vm0, %v920_v25, -inf  ;;  %v745_v37 = vpack.c.bf16 %v898_v18, %v892_v15  ;;  %v957_v38 = vld [vmem:[%s1330_s0 + $0x168] sm:$0xff] }
   0x7   :  { %v962_v39 = vld [vmem:[%s1330_s0 + $0x170] sm:$0xff]  ;;  %v967_v40 = vld [vmem:[%s1330_s0 + $0x178] sm:$0xff]  ;;  %v313_v41 = vmax.f32 %v309_v27, %v312_v29  ;;  %v315_v42 = vmax.f32 %v311_v28, %v314_v30  ;;  %v322_v43 = vsel %vm236_vm0, %v925_v26, -inf  ;;  %v324_v44 = vsel %vm236_vm0, %v934_v31, -inf  ;;  %v22_v50 = vld [vmem:[%s1330_s0] sm:$0xff] }
   0x8   :  { %v976_v45 = vld [vmem:[%s1330_s0 + $0x190] sm:$0xff]  ;;  %v326_v46 = vsel %vm236_vm0, %v939_v32, -inf  ;;  %v328_v47 = vsel %vm236_vm0, %v944_v33, -inf  ;;  %v330_v48 = vsel %vm236_vm0, %v957_v38, -inf  ;;  %v986_v49 = vsel %vm236_vm0, %v962_v39, -inf  ;;  %v994_v51 = vld [vmem:[%s1330_s0 + $0x198] sm:$0xff] }
   0x9   :  { %v317_v52 = vmax.f32 %v313_v41, %v316_v34  ;;  %v319_v53 = vmax.f32 %v315_v42, %v318_v35  ;;  %v334_v54 = vsel %vm236_vm0, %v967_v40, -inf  ;;  %v1000_v55 = vsel %vm236_vm0, %v976_v45, -inf  ;;  %v23_v56 = vld [vmem:[%s1330_s0 + $0x8] sm:$0xff]  ;;  %v1012_v58 = vld [vmem:[%s1330_s0 + $0x10] sm:$0xff]  ;;  %v1017_v59 = vld [vmem:[%s1330_s0 + $0x18] sm:$0xff] }
   0xa   :  { %v1007_v57 = vsel %vm236_vm0, %v994_v51, -inf  ;;  %v705_v60 = vpack.c.bf16 %v23_v56, %v22_v50  ;;  %v237_v61 = vsel %vm236_vm0, %v22_v50, -inf  ;;  %v238_v62 = vsel %vm236_vm0, %v23_v56, -inf  ;;  %v1024_v1 = vld [vmem:[%s1330_s0 + $0x20] sm:$0xff]  ;;  %v1029_v2 = vld [vmem:[%s1330_s0 + $0x28] sm:$0xff]  ;;  %v1038_v8 = vld [vmem:[%s1330_s0 + $0x30] sm:$0xff] }
   0xb   :  { %v321_v63 = vmax.f32 %v317_v52, %v320_v36  ;;  %v323_v0 = vmax.f32 %v319_v53, %v322_v43  ;;  %v239_v3 = vsel %vm236_vm0, %v1012_v58, -inf  ;;  %v241_v6 = vsel %vm236_vm0, %v1017_v59, -inf  ;;  %v1043_v9 = vld [vmem:[%s1330_s0 + $0x38] sm:$0xff]  ;;  %v1052_v27 = vld [vmem:[%s1330_s0 + $0x40] sm:$0xff]  ;;  %v1057_v28 = vld [vmem:[%s1330_s0 + $0x48] sm:$0xff] }
   0xc   :  { %706 = vmatpush3.bf16.msra.mxu0 %v705_v60  ;;  %v240_v11 = vmax.f32 %v237_v61, %v239_v3  ;;  %v242_v16 = vmax.f32 %v238_v62, %v241_v6  ;;  %v243_v17 = vsel %vm236_vm0, %v1024_v1, -inf  ;;  %v245_v20 = vsel %vm236_vm0, %v1029_v2, -inf  ;;  %v1066_v34 = vld [vmem:[%s1330_s0 + $0x50] sm:$0xff]  ;;  %v1071_v35 = vld [vmem:[%s1330_s0 + $0x58] sm:$0xff]  ;;  %v1080_v50 = vld [vmem:[%s1330_s0 + $0x60] sm:$0xff] }
   0xd   :  { %v325_v21 = vmax.f32 %v321_v63, %v324_v44  ;;  %v327_v22 = vmax.f32 %v323_v0, %v326_v46  ;;  %v247_v29 = vsel %vm236_vm0, %v1038_v8, -inf  ;;  %v249_v30 = vsel %vm236_vm0, %v1043_v9, -inf  ;;  %v1085_v52 = vld [vmem:[%s1330_s0 + $0x68] sm:$0xff]  ;;  %v1090_v53 = vld [vmem:[%s1330_s0 + $0x70] sm:$0xff]  ;;  %v41_v61 = vld [vmem:[%s1330_s0 + $0x98] sm:$0xff] }
   0xe   :  { %v244_v36 = vmax.f32 %v240_v11, %v243_v17  ;;  %v246_v41 = vmax.f32 %v242_v16, %v245_v20  ;;  %v251_v42 = vsel %vm236_vm0, %v1052_v27, -inf  ;;  %v253_v43 = vsel %vm236_vm0, %v1057_v28, -inf  ;;  %v40_v60 = vld [vmem:[%s1330_s0 + $0x90] sm:$0xff]  ;;  %v74_v20 = vld [vmem:[%s1330_s0 + $0x1a0] sm:$0xff] }
   0xf   :  { %v329_v44 = vmax.f32 %v325_v21, %v328_v47  ;;  %v331_v46 = vmax.f32 %v327_v22, %v330_v48  ;;  %v255_v56 = vsel %vm236_vm0, %v1066_v34, -inf  ;;  %v257_v47 = vsel %vm236_vm0, %v1071_v35, -inf  ;;  %v1099_v48 = vld [vmem:[%s1330_s0 + $0x78] sm:$0xff]  ;;  %v75_v21 = vld [vmem:[%s1330_s0 + $0x1a8] sm:$0xff] }
  0x10   :  { %v248_v62 = vmax.f32 %v244_v36, %v247_v29  ;;  %v250_v63 = vmax.f32 %v246_v41, %v249_v30  ;;  %v259_v0 = vsel %vm236_vm0, %v1080_v50, -inf  ;;  %v261_v3 = vsel %vm236_vm0, %v1085_v52, -inf }
  0x11   :  { %v333_v6 = vmax.f32 %v329_v44, %v986_v49  ;;  %v335_v11 = vmax.f32 %v331_v46, %v334_v54  ;;  %v263_v16 = vsel %vm236_vm0, %v1090_v53, -inf  ;;  %v265_v17 = vsel %vm236_vm0, %v1099_v48, -inf  ;;  %v42_v46 = vld [vmem:[%s1330_s0 + $0xa0] sm:$0xff] }
  0x12   :  { %v252_v22 = vmax.f32 %v248_v62, %v251_v42  ;;  %v254_v29 = vmax.f32 %v250_v63, %v253_v43  ;;  %v1123_v30 = vsel %vm236_vm0, %v40_v60, -inf  ;;  %v1126_v49 = vsel %vm236_vm0, %v41_v61, -inf  ;;  %v43_v42 = vld [vmem:[%s1330_s0 + $0xa8] sm:$0xff] }
  0x13   :  { %v337_v54 = vmax.f32 %v333_v6, %v857_v4  ;;  %v339_v36 = vmax.f32 %v335_v11, %v860_v5  ;;  %v739_v41 = vpack.c.bf16 %v994_v51, %v976_v45  ;;  %v707_v44 = vpack.c.bf16 %v41_v61, %v40_v60  ;;  %v76_v60 = vld [vmem:[%s1330_s0 + $0x1b0] sm:$0xff]  ;;  %v45_v61 = vld [vmem:[%s1330_s0 + $0xb8] sm:$0xff] }
  0x14   :  { %v256_v43 = vmax.f32 %v252_v22, %v255_v56  ;;  %v258_v62 = vmax.f32 %v254_v29, %v257_v47  ;;  %v709_v63 = vpack.c.bf16 %v1017_v59, %v1012_v58  ;;  %v743_v4 = vpack.c.bf16 %v75_v21, %v74_v20  ;;  %v77_v56 = vld [vmem:[%s1330_s0 + $0x1b8] sm:$0xff]  ;;  %v44_v47 = vld [vmem:[%s1330_s0 + $0xb0] sm:$0xff] }
  0x15   :  { %v341_v5 = vmax.f32 %v337_v54, %v1000_v55  ;;  %v343_v6 = vmax.f32 %v339_v36, %v1007_v57  ;;  %740 = vmatprep.subr.bf16.mxu1 %v739_v41  ;;  %708 = vmatprep.subr.bf16.mxu0 %v707_v44  ;;  %v344_v45 = vsel %vm236_vm0, %v74_v20, -inf  ;;  %v346_v51 = vsel %vm236_vm0, %v75_v21, -inf }
  0x16   :  { %v260_v58 = vmax.f32 %v256_v43, %v259_v0  ;;  %v262_v59 = vmax.f32 %v258_v62, %v261_v3  ;;  %742 = vmatpush3.bf16.msra.mxu1 %v741_v23  ;;  %710 = vmatpush3.bf16.msra.mxu0 %v709_v63  ;;  %v711_v55 = vpack.c.bf16 %v43_v42, %v42_v46  ;;  %v275_v57 = vsel %vm236_vm0, %v42_v46, -inf }
  0x17   :  { %8 = vsyncpa [#allocation5], 0  ;;  %744 = vmatprep.subr.bf16.mxu1 %v743_v4  ;;  %v345_v0 = vmax.f32 %v341_v5, %v344_v45  ;;  %v347_v3 = vmax.f32 %v343_v6, %v346_v51  ;;  %v277_v11 = vsel %vm236_vm0, %v43_v42, -inf  ;;  %v713_v13 = vpack.c.bf16 %v1029_v2, %v1024_v1  ;;  %v78_v22 = vld [vmem:[%s1330_s0 + $0x1c0] sm:$0xff]  ;;  %v79_v29 = vld [vmem:[%s1330_s0 + $0x1c8] sm:$0xff]  ;;  %s826_s9 = smov [#allocation4]  }
  0x18   :  { %v264_v14 = vmax.f32 %v260_v58, %v263_v16  ;;  %v266_v23 = vmax.f32 %v262_v59, %v265_v17  ;;  %712 = vmatprep.subr.bf16.mxu0 %v711_v55  ;;  %v747_v20 = vpack.c.bf16 %v77_v56, %v76_v60  ;;  %v348_v21 = vsel %vm236_vm0, %v76_v60, -inf  ;;  %v46_v46 = vld [vmem:[%s1330_s0 + $0xc0] sm:$0xff]  ;;  %v47_v42 = vld [vmem:[%s1330_s0 + $0xc8] sm:$0xff]  ;;  %v80_v4 = vld [vmem:[%s1330_s0 + $0x1d0] sm:$0xff]  ;;  %s566_s10 = sshll.u32 %s826_s9, 4  ;;  %s567_s10 = int_to_ptr.vmem [resolvable:$true] %s566_s10 }
  0x19   :  { %v349_v54 = vmax.f32 %v345_v0, %v348_v21  ;;  %v350_v36 = vsel %vm236_vm0, %v77_v56, -inf  ;;  %v715_v41 = vpack.c.bf16 %v45_v61, %v44_v47  ;;  %v279_v1 = vsel %vm236_vm0, %v44_v47, -inf  ;;  %v83_v47 = vld [vmem:[%s1330_s0 + $0x1e8] sm:$0xff]  ;;  %s797_s11 = scalar_lea.vmem %s567_s10, 32  ;;  %p802_p1 = scmp.lt.s32.totalorder %s567_s10, %s567_s10 }
  0x1a   :  { %v268_v2 = vmax.f32 %v264_v14, %v866_v7  ;;  %v270_v16 = vmax.f32 %v266_v23, %v877_v12  ;;  %746 = vmatpush3.bf16.msra.mxu1 %v745_v37  ;;  %714 = vmatpush3.bf16.msra.mxu0 %v713_v13  ;;  %v351_v17 = vmax.f32 %v347_v3, %v350_v36  ;;  %v281_v44 = vsel %vm236_vm0, %v45_v61, -inf  ;;  %p798_p0 = scmp.ne.s32.totalorder %s567_s10, %s797_s11  ;;  %p803_p2 = scmp.lt.s32.totalorder %s797_s11, %s797_s11 }
  0x1b   :  { %748 = vmatprep.subr.bf16.mxu1 %v747_v20  ;;  %716 = vmatprep.subr.bf16.mxu0 %v715_v41  ;;  %v749_v7 = vpack.c.bf16 %v915_v24, %v903_v19  ;;  %v717_v12 = vpack.c.bf16 %v1043_v9, %v1038_v8  ;;  %v751_v15 = vpack.c.bf16 %v79_v29, %v78_v22  ;;  %v352_v18 = vsel %vm236_vm0, %v78_v22, -inf  ;;  %v81_v19 = vld [vmem:[%s1330_s0 + $0x1d8] sm:$0xff] }
  0x1c   :  { %v272_v37 = vmax.f32 %v268_v2, %v1123_v30  ;;  %v274_v43 = vmax.f32 %v270_v16, %v1126_v49  ;;  %v353_v62 = vmax.f32 %v349_v54, %v352_v18  ;;  %v354_v63 = vsel %vm236_vm0, %v79_v29, -inf  ;;  %v48_v30 = vld [vmem:[%s1330_s0 + $0xd0] sm:$0xff]  ;;  %v49_v49 = vld [vmem:[%s1330_s0 + $0xd8] sm:$0xff]  ;;  %p804_p3 = por %p803_p2, %p802_p1 }
  0x1d   :  { %v355_v24 = vmax.f32 %v351_v17, %v354_v63  ;;  %v719_v8 = vpack.c.bf16 %v47_v42, %v46_v46  ;;  %v283_v9 = vsel %vm236_vm0, %v46_v46, -inf  ;;  %v285_v5 = vsel %vm236_vm0, %v47_v42, -inf  ;;  %v84_v29 = vld [vmem:[%s1330_s0 + $0x1f0] sm:$0xff]  ;;  %v85_v54 = vld [vmem:[%s1330_s0 + $0x1f8] sm:$0xff] }
  0x1e   :  { %v276_v6 = vmax.f32 %v272_v37, %v275_v57  ;;  %v278_v45 = vmax.f32 %v274_v43, %v277_v11  ;;  %750 = vmatpush3.bf16.msra.mxu1 %v749_v7  ;;  %718 = vmatpush3.bf16.msra.mxu0 %v717_v12  ;;  %v753_v51 = vpack.c.bf16 %v925_v26, %v920_v25  ;;  %v356_v60 = vsel %vm236_vm0, %v80_v4, -inf  ;;  %v82_v57 = vld [vmem:[%s1330_s0 + $0x1e0] sm:$0xff]  ;;  %v52_v16 = vld [vmem:[%s1330_s0 + $0xf0] sm:$0xff]  ;;  %v53_v17 = vld [vmem:[%s1330_s0 + $0xf8] sm:$0xff]  ;;  %p805_p4 = pnand %p804_p3, %p798_p0 }
  0x1f   :  { %752 = vmatprep.subr.bf16.mxu1 %v751_v15  ;;  %720 = vmatprep.subr.bf16.mxu0 %v719_v8  ;;  %v721_v56 = vpack.c.bf16 %v1057_v28, %v1052_v27  ;;  %v755_v58 = vpack.c.bf16 %v81_v19, %v80_v4  ;;  %v357_v59 = vmax.f32 %v353_v62, %v356_v60  ;;  %v358_v55 = vsel %vm236_vm0, %v81_v19, -inf  ;;  %v50_v27 = vld [vmem:[%s1330_s0 + $0xe0] sm:$0xff]  ;;  %v51_v28 = vld [vmem:[%s1330_s0 + $0xe8] sm:$0xff] }
  0x20   :  { %v280_v25 = vmax.f32 %v276_v6, %v279_v1  ;;  %v282_v26 = vmax.f32 %v278_v45, %v281_v44  ;;  %v359_v61 = vmax.f32 %v355_v24, %v358_v55  ;;  %v723_v0 = vpack.c.bf16 %v49_v49, %v48_v30 }
  0x21   :  { %v287_v3 = vsel %vm236_vm0, %v48_v30, -inf  ;;  %v289_v11 = vsel %vm236_vm0, %v49_v49, -inf  ;;  %v757_v13 = vpack.c.bf16 %v939_v32, %v934_v31  ;;  %v725_v14 = vpack.c.bf16 %v1071_v35, %v1066_v34 }
  0x22   :  { %v284_v23 = vmax.f32 %v280_v25, %v283_v9  ;;  %v286_v20 = vmax.f32 %v282_v26, %v285_v5  ;;  %754 = vmatpush3.bf16.msra.mxu1 %v753_v51  ;;  %722 = vmatpush3.bf16.msra.mxu0 %v721_v56  ;;  %v759_v21 = vpack.c.bf16 %v83_v47, %v82_v57  ;;  %v360_v22 = vsel %vm236_vm0, %v82_v57, -inf  ;;  %v388_v57 = vld [vmem:[%s1331_s1] sm:$0xff] }
  0x23   :  { %756 = vmatprep.subr.bf16.mxu1 %v755_v58  ;;  %724 = vmatprep.subr.bf16.mxu0 %v723_v0  ;;  %v361_v31 = vmax.f32 %v357_v59, %v360_v22  ;;  %v362_v32 = vsel %vm236_vm0, %v83_v47, -inf  ;;  %v727_v34 = vpack.c.bf16 %v51_v28, %v50_v27  ;;  %v291_v35 = vsel %vm236_vm0, %v50_v27, -inf  ;;  %v396_v58 = vld [vmem:[%s1331_s1 + $0x40] sm:$0xff]  ;;  %v397_v59 = vld [vmem:[%s1331_s1 + $0x48] sm:$0xff]  ;;  %v399_v0 = vld [vmem:[%s1331_s1 + $0x58] sm:$0xff] }
  0x24   :  { %v288_v36 = vmax.f32 %v284_v23, %v287_v3  ;;  %v290_v41 = vmax.f32 %v286_v20, %v289_v11  ;;  %v363_v1 = vmax.f32 %v359_v61, %v362_v32  ;;  %v293_v2 = vsel %vm236_vm0, %v51_v28, -inf  ;;  %v389_v47 = vld [vmem:[%s1331_s1 + $0x8] sm:$0xff]  ;;  %v398_v61 = vld [vmem:[%s1331_s1 + $0x50] sm:$0xff]  ;;  %v391_v3 = vld [vmem:[%s1331_s1 + $0x18] sm:$0xff] }
  0x25   :  { %v761_v44 = vpack.c.bf16 %v957_v38, %v944_v33  ;;  %v729_v46 = vpack.c.bf16 %v1085_v52, %v1080_v50  ;;  %v763_v42 = vpack.c.bf16 %v85_v54, %v84_v29  ;;  %v364_v7 = vsel %vm236_vm0, %v84_v29, -inf  ;;  %v390_v28 = vld [vmem:[%s1331_s1 + $0x10] sm:$0xff]  ;;  %v392_v23 = vld [vmem:[%s1331_s1 + $0x20] sm:$0xff]  ;;  %v395_v32 = vld [vmem:[%s1331_s1 + $0x38] sm:$0xff] }
  0x26   :  { %758 = vmatpush3.bf16.msra.mxu1 %v757_v13  ;;  %726 = vmatpush3.bf16.msra.mxu0 %v725_v14  ;;  %v292_v12 = vmax.f32 %v288_v36, %v291_v35  ;;  %v294_v15 = vmax.f32 %v290_v41, %v293_v2  ;;  %v365_v18 = vmax.f32 %v361_v31, %v364_v7  ;;  %v366_v37 = vsel %vm236_vm0, %v85_v54, -inf  ;;  %v400_v13 = vld [vmem:[%s1331_s1 + $0x60] sm:$0xff]  ;;  %v401_v14 = vld [vmem:[%s1331_s1 + $0x68] sm:$0xff]  ;;  %v402_v29 = vld [vmem:[%s1331_s1 + $0x70] sm:$0xff] }
  0x27   :  { %760 = vmatprep.subr.bf16.mxu1 %v759_v21  ;;  %728 = vmatprep.subr.bf16.mxu0 %v727_v34  ;;  %v367_v43 = vmax.f32 %v363_v1, %v366_v37  ;;  %v731_v62 = vpack.c.bf16 %v53_v17, %v52_v16  ;;  %v295_v63 = vsel %vm236_vm0, %v52_v16, -inf  ;;  %v297_v33 = vsel %vm236_vm0, %v53_v17, -inf  ;;  %v393_v21 = vld [vmem:[%s1331_s1 + $0x28] sm:$0xff]  ;;  %v403_v54 = vld [vmem:[%s1331_s1 + $0x78] sm:$0xff]  ;;  %v394_v31 = vld [vmem:[%s1331_s1 + $0x30] sm:$0xff] }
  0x28   :  { %v296_v38 = vmax.f32 %v292_v12, %v295_v63  ;;  %v298_v50 = vmax.f32 %v294_v15, %v297_v33  ;;  %v765_v19 = vpack.c.bf16 %v967_v40, %v962_v39  ;;  %v733_v24 = vpack.c.bf16 %v1099_v48, %v1090_v53 }
  0x29   :  { %v368_v52 = vmax.f32 %v365_v18, %v367_v43  ;;  %vm377_vm1 = vcmask 1041409   ;;  %vm19_vm2 = vcmask 517120   ;;  %v822_v56 = vmov 0.0  }
  0x2a   :  { %762 = vmatpush3.bf16.msra.mxu1 %v761_v44  ;;  %730 = vmatpush3.bf16.msra.mxu0 %v729_v46  ;;  %v299_v4 = vmax.f32 %v296_v38, %v298_v50  ;;  %20 = vst.msk [vmem:[#allocation2] sm:$0x3] %vm19_vm2, %v822_v56  ;;  %v768_v55 = vpack.c.bf16 %v397_v59, %v396_v58  ;;  %v824_v25 = vmov 0.0|0.0   ;;  %vm825_vm3 = vmmov 0   ;;  %v576_v38 = vld [vmem:[%s1332_s2] ss:$0 sm:$0xff] }
  0x2b   :  { %764 = vmatprep.subr.bf16.mxu1 %v763_v42  ;;  %v369_v8 = vrot.slane %v368_v52, 4  ;;  %732 = vmatprep.subr.bf16.mxu0 %v731_v62  ;;  %v780_v26 = vpack.c.bf16 %v389_v47, %v388_v57  ;;  %v771_v27 = vpack.c.bf16 %v399_v0, %v398_v61  ;;  %v783_v11 = vpack.c.bf16 %v391_v3, %v390_v28 }
  0x2c   :  { %v300_v9 = vrot.slane %v299_v4, 4  ;;  %v774_v20 = vpack.c.bf16 %v401_v14, %v400_v13  ;;  %v786_v22 = vpack.c.bf16 %v393_v21, %v392_v23  ;;  %v777_v36 = vpack.c.bf16 %v403_v54, %v402_v29 }
  0x2d   :  { %v370_v5 = vmax.f32 %v368_v52, %v369_v8  ;;  %v789_v41 = vpack.c.bf16 %v395_v32, %v394_v31  ;;  %vm230_vm4 = vcmask 1040384  }
  0x2e   :  { %v301_v30 = vmax.f32 %v299_v4, %v300_v9  ;;  %766 = vmatpush3.bf16.msra.mxu1 %v765_v19  ;;  %734 = vmatpush3.bf16.msra.mxu0 %v733_v24 }
  0x2f   :  { %v371_v49 = vrot.slane %v370_v5, 2  ;;  %767 = vmatprep.subr.bf16.mxu0 %v824_v25  ;;  %779 = vmatprep.subr.bf16.mxu1 %v824_v25 }
  0x30   :  { %v302_v6 = vrot.slane %v301_v30, 2 }
  0x31   :  { %v372_v45 = vmax.f32 %v370_v5, %v371_v49  ;;  %221 = vmatmul.mubr.f32.vlgmr.msra.gmra.mrb[0].mxu1 %v821_v10  ;;  %151 = vmatmul.mubr.f32.vlgmr.msra.gmra.mrb[0].mxu0 %v821_v10  ;;  %v823_v10 = vmov -inf   ;;  %v226_v12 = vld [vmem:[#allocation2] sm:$0x3] }
  0x32   :  { %v303_v51 = vmax.f32 %v301_v30, %v302_v6  ;;  %21 = vst.msk [vmem:[#allocation3] sm:$0x3] %vm19_vm2, %v823_v10  ;;  %769 = vmatpush3.bf16.msra.mxu0 %v768_v55  ;;  %781 = vmatpush3.bf16.msra.mxu1 %v780_v26 }
  0x33   :  { %v373_v39 = vrot.slane %v372_v45, 1  ;;  %770 = vmatprep.subr.bf16.mxu0 %v824_v25  ;;  %782 = vmatprep.subr.bf16.mxu1 %v824_v25 }
  0x34   :  { %v304_v40 = vrot.slane %v303_v51, 1  ;;  %681 = vmatprep.mubr.msk.f32.mxu0 %vm825_vm3, %v822_v56  ;;  %700 = vmatprep.mubr.msk.f32.mxu1 %vm825_vm3, %v822_v56 }
  0x35   :  { %v374_v60 = vmax.f32 %v372_v45, %v373_v39 }
  0x36   :  { %v305_v53 = vmax.f32 %v303_v51, %v304_v40  ;;  %772 = vmatpush3.bf16.msra.mxu0 %v771_v27  ;;  %784 = vmatpush3.bf16.msra.mxu1 %v783_v11 }
  0x37   :  { %773 = vmatprep.subr.bf16.mxu0 %v824_v25  ;;  %785 = vmatprep.subr.bf16.mxu1 %v824_v25 }
  0x38   :  { %v378_v48 = vsel %vm377_vm1, %v374_v60, %v305_v53 }
  0x39   :  { %v235_v34 = vld [vmem:[#allocation3] sm:$0x3] }
  0x3a   :  { %v380_v35 = vmax.f32 %v235_v34, %v378_v48  ;;  %775 = vmatpush3.bf16.msra.mxu0 %v774_v20  ;;  %787 = vmatpush3.bf16.msra.mxu1 %v786_v22 }
  0x3b   :  { %776 = vmatprep.subr.bf16.mxu0 %v824_v25  ;;  %788 = vmatprep.subr.bf16.mxu1 %v824_v25 }
  0x3c   :  { %381 = vst.msk [vmem:[#allocation3] sm:$0x3] %vm19_vm2, %v380_v35 }
  0x3e   :  { %778 = vmatpush3.bf16.msra.mxu0 %v777_v36  ;;  %790 = vmatpush3.bf16.msra.mxu1 %v789_v41 }
  0x43   :  { %v387_v1 = vld [vmem:[#allocation3] sm:$0x3] }
  0x44   :  { %682 = vmatmul.mubr.msk.f32.vlgmr.msra.gmra.mrb[2].mxu0 %vm236_vm0, %v387_v1 }
 0x104   :  { %v644_v2 = vpop.f32.mrb[0].mxu1  ;;  %v609_v16 = vpop.f32.mrb[0].mxu0 }
 0x105   :  { %v645_v17 = vpop.f32.mrb[1].mxu1  ;;  %v610_v44 = vpop.f32.mrb[1].mxu0 }
 0x106   :  { %v646_v46 = vadd.f32 %v645_v17, %v644_v2  ;;  %v611_v42 = vadd.f32 %v610_v44, %v609_v16 }
 0x108   :  { %v228_v7 = vrot.slane %v646_v46, 7 }
 0x10a   :  { %v231_v15 = vsel %vm230_vm4, %v611_v42, %v228_v7 }
 0x10b   :  { %v232_v18 = vadd.f32 %v231_v15, %v226_v12 }
 0x10d   :  { %234 = vst.msk [vmem:[#allocation2] sm:$0x3] %vm19_vm2, %v232_v18 }
 0x114   :  { %v385_v37 = vld [vmem:[#allocation2] sm:$0x3] }
 0x115   :  { %v386_v43 = vmul.f32 0.00390625, %v385_v37 }
 0x117   :  { %701 = vmatmul.mubr.msk.f32.vlgmr.msra.gmra.mrb[2].mxu1 %vm236_vm0, %v386_v43  ;;  %v473_v62 = vpop.f32.mrb[2].mxu0 }
 0x118   :  { %v683_v63 = vpop.f32.mrb[3].mxu0 }
 0x1ea   :  { %v546_v33 = vpop.f32.mrb[2].mxu1 }
 0x1eb   :  { %v547_v50 = vadd.f32 %v546_v33, %v473_v62  ;;  %v702_v52 = vpop.f32.mrb[3].mxu1 }
 0x1ed   :  { %v557_v4 = vadd.f32 %v576_v38, %v547_v50 }
 0x1ef   :  { %v558_v19 = vmax.f32 %v557_v4, 0.0 }
 0x1f1   :  { %559 = vst.msk [vmem:[#allocation4] sm:$0x3] %vm19_vm2, %v558_v19 }
 0x1f2   :  { %808 = shalt.err (!%p805_p4)
}
 0x1f3   :  { %s809_s2 = scalar_lea.hbm %s1333_s3, 32 }
 0x1f4   :  { %p810_p5 = scmp.ne.s32.totalorder %s1333_s3, %s809_s2  ;;  %p813_p6 = scmp.lt.u32.totalorder %s809_s2, %s1333_s3 }
 0x1f6   :  { %p815_p7 = pnand %p813_p6, %p810_p5 }
 0x1f8   :  { %818 = shalt.err (!%p815_p7)
}
 0x1f9   :  { %569 = dma.vmem_to_hbm [thread:$0]  %s567_s10, 32, %s1333_s3, [#allocation5]  }
 0x1fa   :  { %819 = dma.done.wait [#allocation5], 32  }
 0x1fb   :  { %820 = vsyncadd [#allocation5], 4294967264 }
 0x1fc   :  { %573 = vsyncpa [#allocation5], 1 }

</bundles_post_ra>
